<compile_context>
chip_gen: v7x
topology: tpu7x:2x2x1
jax: 0.10.0
libtpu: 0.0.40
codegen_flags: <defaults>
</compile_context>

<pallas_src>
import functools

import jax
import jax.numpy as jnp
from jax.experimental import pallas as pl
from jax.experimental.pallas import tpu as pltpu


def _round_up(x, m):
    return ((x + m - 1) // m) * m


def _sublane_for_itemsize(itemsize):
    # 32-bit packs 8 rows / vreg, 16-bit packs 16, 8-bit packs 32.
    return {4: 8, 2: 16, 1: 32}.get(itemsize, 8)


def _vmem_capacity_bytes():
    """Physical VMEM per TensorCore; conservative 64 MiB fallback."""
    try:
        cap = int(pltpu.get_tpu_info().vmem_capacity_bytes)
        if cap > 0:
            return cap
    except Exception:
        pass
    try:
        kind = jax.devices()[0].device_kind.lower()
        if "v7" in kind:
            return 64 << 20
        if any(t in kind for t in ("v5", "v6", "lite")):
            return 128 << 20
    except Exception:
        pass
    return 64 << 20  # safe floor


def _num_tensorcores_per_chip():
    """2 on megacore / dual-TC chips (v7x, v4, v5p), 1 on v5e/v6e."""
    try:
        kind = jax.devices()[0].device_kind.lower()
    except Exception:
        return 1
    if "v5e" in kind or "v6e" in kind or "lite" in kind:
        return 1
    if "v7" in kind or "v4" in kind or "v5p" in kind:
        return 2
    return 1


def _pick_row_tile(rows, hidden, in_itemsize, out_itemsize, vmem_budget_bytes,
                   sublane, min_steps, max_tile=2048):
    """Largest row tile fitting the VMEM budget, respecting sublane packing.

    Per tile-row footprint: 2x double-buffered input (in_itemsize) +
    2x double-buffered output (out_itemsize) + ~2 f32 working copies (8 B).
    """
    bytes_per_row = hidden * (2 * in_itemsize + 2 * out_itemsize + 8)
    tile = vmem_budget_bytes // max(bytes_per_row, 1)
    rows_ceil = _round_up(rows, sublane)
    tile = min(tile, max_tile, rows_ceil)
    tile = max((tile // sublane) * sublane, sublane)
    # On dual-TC chips keep enough grid steps (>= 2 per core) so both cores get
    # work and can still double-buffer. Single-TC chips never shrink the tile.
    while min_steps > 1 and tile > sublane and pl.cdiv(rows, tile) < min_steps:
        tile = max(((tile // 2) // sublane) * sublane, sublane)
    return tile


def _rmsnorm_kernel(x_ref, w_ref, o_ref, *, eps, inv_hidden):
    # Pass 1: upcast, square, reduce over hidden.
    xf = x_ref[...].astype(jnp.float32)                          # (tile_rows, hidden)
    variance = jnp.sum(xf * xf, axis=-1, keepdims=True) * inv_hidden
    inv = jax.lax.rsqrt(variance + eps)
    # Pass 2: re-read + re-cast x for the scale so the full f32 upcast is not
    # live across the reduction (frees ~tile*hidden*4 B; re-load is free in a
    # mem-bound kernel). Truncate back to the input dtype before the weight
    # multiply, matching PyTorch's `hidden_states.to(input_dtype)`.
    normed = (x_ref[...].astype(jnp.float32) * inv).astype(x_ref.dtype)
    o_ref[...] = (w_ref[...] * normed).astype(o_ref.dtype)


def llama_rmsnorm(hidden_states, weight, eps=1e-6, row_tile=None):
    """RMSNorm over the last dim, matching LlamaRMSNorm.forward semantics.

    Output dtype follows PyTorch promotion: dtype of
    weight * hidden_states.to(input_dtype).
    """
    orig_shape = hidden_states.shape
    hidden = orig_shape[-1]
    rows = 1
    for d in orig_shape[:-1]:
        rows *= d

    in_dtype = hidden_states.dtype
    out_dtype = jnp.promote_types(weight.dtype, in_dtype)
    in_itemsize = jnp.dtype(in_dtype).itemsize
    out_itemsize = jnp.dtype(out_dtype).itemsize
    sublane = _sublane_for_itemsize(in_itemsize)

    # Generation-aware VMEM budgets.
    vmem_cap = _vmem_capacity_bytes()            # 64 MiB v7x, 128 MiB v5e/v6e
    vmem_clamp = int(vmem_cap * 3 // 4)          # ~48 MiB v7x, ~96 MiB v5e/v6e
    tile_budget = max(vmem_clamp - (8 << 20), 8 << 20)
    num_cores = _num_tensorcores_per_chip()
    min_steps = 2 * num_cores if num_cores > 1 else 1

    if row_tile is None:
        row_tile = _pick_row_tile(rows, hidden, in_itemsize, out_itemsize,
                                  tile_budget, sublane, min_steps)
    else:
        row_tile = max(_round_up(row_tile, sublane), sublane)

    x2d = hidden_states.reshape(rows, hidden)
    w2d = weight.reshape(1, hidden)

    # No wrapper-side padding: Pallas masks the ragged last block. Rows are
    # independent, so garbage in OOB lanes of the final block never reaches a
    # real output row and OOB stores are discarded.
    grid = (pl.cdiv(rows, row_tile),)

    # Scoped-VMEM limit: double-buffered in/out tiles + f32 working copies +
    # small headroom (weight tile, semaphores), clamped within physical VMEM.
    in_tile_bytes = row_tile * hidden * in_itemsize
    out_tile_bytes = row_tile * hidden * out_itemsize
    f32_tile_bytes = row_tile * hidden * 4
    vmem_limit = 2 * in_tile_bytes + 2 * out_tile_bytes + 2 * f32_tile_bytes + (4 << 20)
    vmem_limit = int(min(max(vmem_limit, 16 << 20), vmem_clamp))

    out = pl.pallas_call(
        functools.partial(_rmsnorm_kernel, eps=eps, inv_hidden=1.0 / hidden),
        out_shape=jax.ShapeDtypeStruct((rows, hidden), out_dtype),
        grid_spec=pltpu.PrefetchScalarGridSpec(
            num_scalar_prefetch=0,
            grid=grid,
            in_specs=[
                pl.BlockSpec((row_tile, hidden), lambda i: (i, 0)),
                pl.BlockSpec((1, hidden), lambda i: (0, 0)),
            ],
            out_specs=pl.BlockSpec((row_tile, hidden), lambda i: (i, 0)),
        ),
        compiler_params=pltpu.CompilerParams(
            dimension_semantics=("parallel",),
            vmem_limit_bytes=vmem_limit,
        ),
    )(x2d, w2d)

    return out.reshape(orig_shape[:-1] + (hidden,))


def llama_rmsnorm_reference(hidden_states, weight, eps=1e-6):
    """Pure-JAX reference mirroring the PyTorch module exactly."""
    input_dtype = hidden_states.dtype
    x = hidden_states.astype(jnp.float32)
    variance = jnp.mean(x * x, axis=-1, keepdims=True)
    x = x * jax.lax.rsqrt(variance + eps)
    return weight * x.astype(input_dtype)


if __name__ == "__main__":
    eps = 1e-6
    key = jax.random.PRNGKey(0)

    # --- Test 1: small f32 shape matching the module demo (batch=2, seq=8, hidden=32)
    batch, seq, hidden = 2, 8, 32
    k1, k2 = jax.random.split(key)
    x = jax.random.normal(k1, (batch, seq, hidden), dtype=jnp.float32)
    weight = jnp.ones((hidden,), dtype=jnp.float32)  # nn.Parameter(torch.ones(hidden))

    out = jax.block_until_ready(llama_rmsnorm(x, weight, eps=eps))
    ref = llama_rmsnorm_reference(x, weight, eps=eps)
    assert out.shape == x.shape and out.dtype == ref.dtype
    assert jnp.allclose(out, ref, atol=1e-5, rtol=1e-5), "f32 mismatch vs reference"

    # --- Test 2: bf16 input, fp32 weight, rows not a multiple of the tile
    # (exercises sublane packing, the masked ragged-last-block path, and the
    # PyTorch-style dtype promotion to f32 output).
    batch2, seq2, hidden2 = 3, 20, 256   # rows = 60
    xb = jax.random.normal(k2, (batch2, seq2, hidden2), dtype=jnp.float32).astype(jnp.bfloat16)
    wb = jnp.ones((hidden2,), dtype=jnp.float32)

    out_b = jax.block_until_ready(llama_rmsnorm(xb, wb, eps=eps))
    ref_b = llama_rmsnorm_reference(xb, wb, eps=eps)
    assert out_b.shape == xb.shape and out_b.dtype == ref_b.dtype
    assert jnp.allclose(out_b.astype(jnp.float32), ref_b.astype(jnp.float32),
                        atol=2e-2, rtol=2e-2), "bf16 mismatch vs reference"

    print("KERNEL_OK")
</pallas_src>

<mosaic_0001>
module attributes {stable_mosaic.version = 11 : i64} {
  func.func @_rmsnorm_kernel(%arg0: i32, %arg1: memref<16x32xf32, #tpu.memory_space<vmem>>, %arg2: memref<1x32xf32, #tpu.memory_space<vmem>>, %arg3: memref<16x32xf32, #tpu.memory_space<vmem>>) attributes {dimension_semantics = [#tpu.dimension_semantics<parallel>], iteration_bounds = array<i64: 1>, scalar_prefetch = 0 : i64, scratch_operands = 0 : i64, tpu.core_type = #tpu.core_type<tc>, window_params = [{transform_indices = @transform_0, window_bounds = array<i64: 16, 32>}, {pipeline_mode = #tpu.pipeline_mode<synchronous>, transform_indices = @transform_1, window_bounds = array<i64: 1, 32>}, {transform_indices = @transform_2, window_bounds = array<i64: 16, 32>}]} {
    %c0 = arith.constant 0 : index
    %c0_0 = arith.constant 0 : index
    %0 = vector.load %arg1[%c0, %c0_0] : memref<16x32xf32, #tpu.memory_space<vmem>>, vector<16x32xf32>
    %1 = arith.mulf %0, %0 : vector<16x32xf32>
    %cst = arith.constant dense<0.000000e+00> : vector<16xf32>
    %2 = vector.multi_reduction <add>, %1, %cst [1] : vector<16x32xf32> to vector<16xf32>
    %3 = vector.shape_cast %2 : vector<16xf32> to vector<16x1xf32>
    %cst_1 = arith.constant 3.125000e-02 : f32
    %4 = vector.broadcast %cst_1 : f32 to vector<16x1xf32>
    %5 = arith.mulf %3, %4 : vector<16x1xf32>
    %cst_2 = arith.constant 9.99999997E-7 : f32
    %6 = vector.broadcast %cst_2 : f32 to vector<16x1xf32>
    %7 = arith.addf %5, %6 : vector<16x1xf32>
    %8 = math.rsqrt %7 : vector<16x1xf32>
    %c0_3 = arith.constant 0 : index
    %c0_4 = arith.constant 0 : index
    %9 = vector.load %arg1[%c0_3, %c0_4] : memref<16x32xf32, #tpu.memory_space<vmem>>, vector<16x32xf32>
    %10 = vector.broadcast %8 : vector<16x1xf32> to vector<16x32xf32>
    %11 = arith.mulf %9, %10 : vector<16x32xf32>
    %c0_5 = arith.constant 0 : index
    %c0_6 = arith.constant 0 : index
    %12 = vector.load %arg2[%c0_5, %c0_6] : memref<1x32xf32, #tpu.memory_space<vmem>>, vector<1x32xf32>
    %13 = vector.broadcast %12 : vector<1x32xf32> to vector<16x32xf32>
    %14 = arith.mulf %13, %11 : vector<16x32xf32>
    %c0_7 = arith.constant 0 : index
    %c0_8 = arith.constant 0 : index
    %15 = vector.load %arg3[%c0_7, %c0_8] : memref<16x32xf32, #tpu.memory_space<vmem>>, vector<16x32xf32>
    tpu.vector_store %arg3[%c0_7, %c0_8], %14 {strides = array<i32>} : memref<16x32xf32, #tpu.memory_space<vmem>>, vector<16x32xf32>,
    return
  }
  func.func @transform_0(%arg0: i32) -> (i32, i32) {
    %c0_i32 = arith.constant 0 : i32
    %c0_i32_0 = arith.constant 0 : i32
    return %arg0, %c0_i32 : i32, i32
  }
  func.func @transform_1(%arg0: i32) -> (i32, i32) {
    %c0_i32 = arith.constant 0 : i32
    %c0_i32_0 = arith.constant 0 : i32
    %c0_i32_1 = arith.constant 0 : i32
    return %c0_i32, %c0_i32_0 : i32, i32
  }
  func.func @transform_2(%arg0: i32) -> (i32, i32) {
    %c0_i32 = arith.constant 0 : i32
    %c0_i32_0 = arith.constant 0 : i32
    return %arg0, %c0_i32 : i32, i32
  }
}

</mosaic_0001>

<bundles_post_ra>
// kernel: tpu_custom_call.1
= control target key start
LH: loop header
LB: loop body
LE: loop exit
PB: predicated region body
PF: predicated region fallthrough
CT: control target
= control target key end

     0   :  { %7 = vsyncpa [#allocation3], 0  ;;  %s186_s0 = inlined_call_operand.hbm [shape: f32[16,32], index: 0, kind: input, shape index: {}]   ;;  %s187_s1 = inlined_call_operand.vmem [shape: f32[1,32], index: 1, kind: input, shape index: {}]   ;;  %s188_s2 = inlined_call_operand.hbm [shape: f32[16,32], index: 2, kind: output, shape index: {}]  }
   0x1   :  { %8 = vsyncpa [#allocation4], 0  ;;  %s130_s9 = smov [#allocation2]   ;;  %s82_s13 = scalar_lea.hbm %s186_s0, 256 }
   0x2   :  { %s14_s10 = sshll.u32 %s130_s9, 4  ;;  %p83_p0 = scmp.ne.s32.totalorder %s186_s0, %s82_s13  ;;  %s15_s10 = int_to_ptr.vmem [resolvable:$true] %s14_s10 }
   0x3   :  { %p86_p1 = scmp.lt.u32.totalorder %s82_s13, %s186_s0 }
   0x5   :  { %p88_p2 = pnand %p86_p1, %p83_p0 }
   0x7   :  { %91 = shalt.err (!%p88_p2)
}
   0x8   :  { %s92_s18 = scalar_lea.vmem %s15_s10, 256  ;;  %p97_p4 = scmp.lt.s32.totalorder %s15_s10, %s15_s10 }
   0x9   :  { %p93_p3 = scmp.ne.s32.totalorder %s15_s10, %s92_s18  ;;  %p98_p5 = scmp.lt.s32.totalorder %s92_s18, %s92_s18 }
   0xb   :  { %p99_p6 = por %p98_p5, %p97_p4 }
   0xd   :  { %p100_p7 = pnand %p99_p6, %p93_p3 }
   0xf   :  { %103 = shalt.err (!%p100_p7)
}
  0x10   :  { %s131_s19 = smov 128   ;;  %s132_s20 = smov 8  }
  0x11   :  { %20 = dma.hbm_to_vmem [thread:$0]  %s186_s0, 256, %s15_s10, [#allocation3], %s131_s19, %s131_s19, %s132_s20  }
  0x12   :  { %126 = dma.done.wait [#allocation3], 256  }
  0x13   :  { %127 = vsyncadd [#allocation3], 4294967040  ;;  %v26_v0 = vld [vmem:[#allocation2] sm:$0xff]  ;;  %vm30_vm0 = vcmask 261120   ;;  %v27_v1 = vld [vmem:[#allocation2 + $0x8] sm:$0xff]  ;;  %s133_s24 = smov [#allocation5]  }
  0x14   :  { %v28_v2 = vmul.f32 %v26_v0, %v26_v0  ;;  %v29_v3 = vmul.f32 %v27_v1, %v27_v1  ;;  %v73_v13 = vld [vmem:[%s187_s1] ss:$0 sm:$0xff]  ;;  %s61_s25 = sshll.u32 %s133_s24, 4  ;;  %s62_s25 = int_to_ptr.vmem [resolvable:$true] %s61_s25 }
  0x15   :  { %s104_s26 = scalar_lea.vmem %s62_s25, 256  ;;  %p109_p9 = scmp.lt.s32.totalorder %s62_s25, %s62_s25 }
  0x16   :  { %v31_v4 = vsel %vm30_vm0, %v28_v2, 0.0  ;;  %v34_v5 = vsel %vm30_vm0, %v29_v3, 0.0  ;;  %p105_p8 = scmp.ne.s32.totalorder %s62_s25, %s104_s26  ;;  %p110_p10 = scmp.lt.s32.totalorder %s104_s26, %s104_s26 }
  0x17   :  { %32 = vadd.xlane.f32.xlu0 %v31_v4 }
  0x18   :  { %p111_p11 = por %p110_p10, %p109_p9 }
  0x1a   :  { %p112_p12 = pnand %p111_p11, %p105_p8 }
  0x1b   :  { %35 = vadd.xlane.f32.xlu0 %v34_v5 }
  0xa4   :  { %v33_v6 = vpop.xlane.xlu0 %32 }
  0xa5   :  { %v37_v7 = vmul.f32 0.03125, %v33_v6 }
  0xa7   :  { %v39_v8 = vadd.f32 1e-06, %v37_v7 }
  0xa8   :  { %v36_v9 = vpop.xlane.xlu0 %35 }
  0xa9   :  { %78 = vrsqrt.f32 %v39_v8  ;;  %v38_v10 = vmul.f32 0.03125, %v36_v9 }
  0xab   :  { %v40_v11 = vadd.f32 1e-06, %v38_v10 }
  0xad   :  { %80 = vrsqrt.f32 %v40_v11 }
  0xb3   :  { %v79_v12 = vpop.eup %78 }
  0xb4   :  { %v43_v14 = vmul.f32 %v79_v12, %v26_v0 }
  0xb6   :  { %v52_v15 = vmul.f32 %v73_v13, %v43_v14 }
  0xb7   :  { %v81_v16 = vpop.eup %80 }
  0xb8   :  { %v44_v17 = vmul.f32 %v81_v16, %v27_v1  ;;  %54 = vst.msk [vmem:[#allocation5] sm:$0xff] %vm30_vm0, %v52_v15 }
  0xba   :  { %v53_v18 = vmul.f32 %v73_v13, %v44_v17 }
  0xbc   :  { %55 = vst.msk [vmem:[#allocation5 + $0x8] sm:$0xff] %vm30_vm0, %v53_v18 }
  0xbd   :  { %115 = shalt.err (!%p112_p12)
}
  0xbe   :  { %s116_s28 = scalar_lea.hbm %s188_s2, 256 }
  0xbf   :  { %p117_p13 = scmp.ne.s32.totalorder %s188_s2, %s116_s28  ;;  %p120_p0 = scmp.lt.u32.totalorder %s116_s28, %s188_s2 }
  0xc1   :  { %p122_p1 = pnand %p120_p0, %p117_p13 }
  0xc3   :  { %125 = shalt.err (!%p122_p1)
}
  0xc4   :  { %67 = dma.vmem_to_hbm [thread:$0]  %s62_s25, 256, %s188_s2, [#allocation4], %s131_s19, %s131_s19, %s132_s20  }
  0xc5   :  { %128 = dma.done.wait [#allocation4], 256  }
  0xc6   :  { %129 = vsyncadd [#allocation4], 4294967040 }
  0xc7   :  { %71 = vsyncpa [#allocation3], 1 }
  0xc8   :  { %72 = vsyncpa [#allocation4], 1 }

</bundles_post_ra>
